<compile_context>
chip_gen: v5e
topology: v5e:2x2
jax: 0.10.0
libtpu: 0.0.40
codegen_flags: <defaults>
</compile_context>

<pallas_src>
import functools

import jax
import jax.numpy as jnp
from jax import lax
from jax.experimental import pallas as pl
from jax.experimental.pallas import tpu as pltpu


# ----------------------------------------------------------------------------
# Glue: BallQuery + grouping_operation (pure JAX, data-dependent gather)
# ----------------------------------------------------------------------------
def ball_query(radius, nsamples, p2, p1, *, chunk=1024):
    """p2: (B, M, 3) searched points, p1: (B, N, 3) query points -> (B, N, ns) int32.

    Mirrors pointnet2 CUDA ball_query: the first `nsamples` indices (ascending
    index order) of p2 points within `radius` of each query point; missing
    slots padded with the first found index (0 if none). Uses lax.top_k over a
    masked index tensor instead of a full sort, chunked over query points to
    bound the (chunk, M) distance intermediate.
    """
    B, N, _ = p1.shape
    M = p2.shape[1]
    r2 = radius * radius
    iota = jnp.arange(M, dtype=jnp.int32)[None, None, :]

    def one_chunk(p1_c):                                      # (B, n_c, 3)
        d2 = jnp.sum((p1_c[:, :, None, :] - p2[:, None, :, :]) ** 2, axis=-1)
        masked = jnp.where(d2 < r2, iota, M)                  # (B, n_c, M) int32
        neg_topk, _ = lax.top_k(-masked, nsamples)            # ns smallest of `masked`
        sorted_idx = -neg_topk
        first = sorted_idx[..., :1]
        first = jnp.where(first == M, 0, first)
        return jnp.where(sorted_idx == M, first, sorted_idx).astype(jnp.int32)

    if N <= chunk:
        return one_chunk(p1)
    parts = [one_chunk(p1[:, s:s + chunk]) for s in range(0, N, chunk)]
    return jnp.concatenate(parts, axis=1)


def grouping_operation_t(features, idx_t):
    """features: (B, C, M), idx_t: (B, ns, N) -> (B, ns, C, N) (N on lanes)."""
    def one_batch(f, it):                                     # f: (C, M), it: (ns, N)
        return jax.vmap(lambda row: f[:, row])(it)            # -> (ns, C, N)
    return jax.vmap(one_batch)(features, idx_t)


# ----------------------------------------------------------------------------
# Pallas kernels: fused 1x1 conv + max over neighbors + bias + ReLU
# ----------------------------------------------------------------------------
def _corr_kernel(corr_ref, inv_ref, ws_ref, wi_ref, b_ref, out_ref, *,
                 nsamples, chunk):
    # corr_ref: (ns, Cs, TILE_N) bf16   [S2_grouped ; displacement] per sample
    # inv_ref : (Cinv, TILE_N)  bf16    sample-invariant channels (X1)
    # ws_ref  : (Cout, Cs) bf16         wi_ref: (Cout, Cinv) bf16
    # b_ref   : (Cout, 1) f32           out_ref: (Cout, TILE_N)
    ws = ws_ref[...]
    wi = wi_ref[...]
    b = b_ref[...]
    tile = out_ref.shape[-1]
    for c0 in range(0, tile, chunk):                 # static loop; acc stays in vregs
        c1 = c0 + chunk
        acc = jnp.dot(ws, corr_ref[0, :, c0:c1], preferred_element_type=jnp.float32)
        for s in range(1, nsamples):
            acc = jnp.maximum(
                acc, jnp.dot(ws, corr_ref[s, :, c0:c1],
                             preferred_element_type=jnp.float32))
        inv = jnp.dot(wi, inv_ref[:, c0:c1], preferred_element_type=jnp.float32)
        out_ref[:, c0:c1] = jnp.maximum(acc + inv + b, 0.0).astype(out_ref.dtype)


def _corr_kernel_noinv(corr_ref, ws_ref, b_ref, out_ref, *, nsamples, chunk):
    # Same as above, in_channels == 0 path (no sample-invariant input).
    ws = ws_ref[...]
    b = b_ref[...]
    tile = out_ref.shape[-1]
    for c0 in range(0, tile, chunk):
        c1 = c0 + chunk
        acc = jnp.dot(ws, corr_ref[0, :, c0:c1], preferred_element_type=jnp.float32)
        for s in range(1, nsamples):
            acc = jnp.maximum(
                acc, jnp.dot(ws, corr_ref[s, :, c0:c1],
                             preferred_element_type=jnp.float32))
        out_ref[:, c0:c1] = jnp.maximum(acc + b, 0.0).astype(out_ref.dtype)


# ----------------------------------------------------------------------------
# Tiling helpers
# ----------------------------------------------------------------------------
def _vmem_limit_bytes():
    # 64 MiB scoped on 128-MiB parts (v5e/v6e); 32 MiB on v7x (64 MiB physical).
    try:
        cap = pltpu.get_tpu_info().vmem_capacity_bytes
    except Exception:
        cap = 64 * 1024 * 1024
    return int(min(max(cap // 2, 32 * 1024 * 1024), 64 * 1024 * 1024))


def _round_up(a, m):
    return ((a + m - 1) // m) * m


def _choose_tile_and_pad(n, batch, per_lane_bytes, budget_bytes, *, max_tile=8192):
    """Pick (tile, n_pad): tile divides n_pad; both lane-aligned. Tile bounded by
    a VMEM budget (v7x-safe) and shrunk so the grid has enough steps to feed
    both TensorCores on megacore parts."""
    if n <= 512:
        n_pad = _round_up(n, 128)
        return n_pad, n_pad
    n_pad = _round_up(n, 512)
    n_units = n_pad // 512
    budget_units = max(1, min(budget_bytes // (per_lane_bytes * 512), max_tile // 512))
    divisors = [d for d in range(1, n_units + 1) if n_units % d == 0]
    fitting = [d for d in divisors if d <= budget_units]
    best = max(fitting) if fitting else 1
    while best > 1 and batch * (n_units // best) < 8:     # megacore depth (v7x)
        smaller = [d for d in divisors if d < best]
        if not smaller:
            break
        best = max(smaller)
    return 512 * best, n_pad


def _pick_chunk(cout, tile):
    """Sub-tile lane width so the f32 max-accumulator (cout x chunk) is <= 16 vregs."""
    if tile <= 512:
        return tile
    for c in (512, 256, 128):
        if cout * c * 4 <= 64 * 1024:
            return c
    return 128


# ----------------------------------------------------------------------------
# Pallas wrapper
# ----------------------------------------------------------------------------
def fused_conv1x1_relu_max(corr, inv, w_samp, w_inv, bias, *, tile,
                           vmem_limit_bytes, out_dtype=jnp.float32):
    """corr: (B, ns, Cs, N_pad) bf16, inv: (B, Cinv, N_pad) bf16 or None,
    w_samp: (Cout, Cs) bf16, w_inv: (Cout, Cinv) bf16 or None, bias: (Cout, 1) f32.

    out[b, :, n] = relu(max_s(w_samp @ corr[b, s, :, n]) + w_inv @ inv[b, :, n] + bias)
    """
    B, ns, cs, n_pad = corr.shape
    cout = bias.shape[0]
    assert n_pad % tile == 0
    grid = (B, n_pad // tile)
    chunk = _pick_chunk(cout, tile)

    corr_spec = pl.BlockSpec((None, ns, cs, tile), lambda b, j: (b, 0, 0, j))
    ws_spec = pl.BlockSpec((cout, cs), lambda b, j: (0, 0))
    b_spec = pl.BlockSpec((cout, 1), lambda b, j: (0, 0))
    out_spec = pl.BlockSpec((None, cout, tile), lambda b, j: (b, 0, j))

    if inv is not None:
        cinv = inv.shape[1]
        kernel = functools.partial(_corr_kernel, nsamples=ns, chunk=chunk)
        in_specs = [corr_spec,
                    pl.BlockSpec((None, cinv, tile), lambda b, j: (b, 0, j)),
                    ws_spec,
                    pl.BlockSpec((cout, cinv), lambda b, j: (0, 0)),
                    b_spec]
        args = (corr, inv, w_samp, w_inv, bias)
    else:
        kernel = functools.partial(_corr_kernel_noinv, nsamples=ns, chunk=chunk)
        in_specs = [corr_spec, ws_spec, b_spec]
        args = (corr, w_samp, bias)

    return pl.pallas_call(
        kernel,
        out_shape=jax.ShapeDtypeStruct((B, cout, n_pad), out_dtype),
        grid_spec=pltpu.PrefetchScalarGridSpec(
            num_scalar_prefetch=0,
            grid=grid,
            in_specs=in_specs,
            out_specs=out_spec,
        ),
        compiler_params=pltpu.CompilerParams(
            dimension_semantics=("parallel", "parallel"),
            vmem_limit_bytes=vmem_limit_bytes,
        ),
    )(*args)


# ----------------------------------------------------------------------------
# Module-equivalent forward
# ----------------------------------------------------------------------------
class PointSpatioTemporalCorrelationPallas:
    def __init__(self, radius, nsamples, in_channels, out_channels, key):
        self.radius = float(radius)
        self.nsamples = int(nsamples)
        self.in_channels = int(in_channels)
        self.out_channels = int(out_channels)
        k1, k2, k3, k4 = jax.random.split(key, 4)
        cin_fc = in_channels * 2 + 3
        cin_fc1 = out_channels + 3
        # Conv2d(kernel_size=1) <=> dense weight (Cout, Cin). PyTorch channel
        # order of `correlation`: [S2_grouped (C) | X1_repeated (C) | disp (3)].
        self.fc_w = (jax.random.normal(k1, (out_channels, cin_fc), jnp.float32)
                     * (1.0 / jnp.sqrt(cin_fc)))
        self.fc_b = jax.random.normal(k2, (out_channels, 1), jnp.float32) * 0.01
        self.fc1_w = (jax.random.normal(k3, (out_channels, cin_fc1), jnp.float32)
                      * (1.0 / jnp.sqrt(cin_fc1)))
        self.fc1_b = jax.random.normal(k4, (out_channels, 1), jnp.float32) * 0.01

    def __call__(self, P1, P2, X1, S2, *, out_dtype=jnp.float32):
        """P1, P2: (B, N, 3)   X1, S2: (B, C, N)   ->   S1: (B, Cout, N)."""
        B, N, _ = P1.shape
        ns = self.nsamples
        has_x1 = self.in_channels != 0

        # Split weights into per-sample and sample-invariant parts.
        if has_x1:
            c = self.in_channels
            w_samp = jnp.concatenate([self.fc_w[:, :c], self.fc_w[:, 2 * c:]], axis=1)
            w_inv = self.fc_w[:, c:2 * c]
            bias = self.fc_b
            cs, cinv = c + 3, c
        else:
            w_samp, w_inv, bias = self.fc1_w, None, self.fc1_b
            cs, cinv = self.out_channels + 3, 0

        out_bytes = jnp.dtype(out_dtype).itemsize
        per_lane_bytes = 2 * (ns * cs * 2 + cinv * 2 + self.out_channels * out_bytes)
        vmem_limit = _vmem_limit_bytes()
        tile, n_pad = _choose_tile_and_pad(
            N, B, per_lane_bytes, vmem_limit - 4 * 1024 * 1024)

        # Pad the query-side point count BEFORE the gather (no extra copy of the
        # big correlation tensor); padded columns are sliced off at the end.
        pad = n_pad - N
        P1p = jnp.pad(P1, ((0, 0), (0, pad), (0, 0))) if pad else P1

        # ---- Glue (data-dependent gather; stays in plain JAX) ----------------
        # TODO(synk): fuse ball_query + gather into the kernel via scalar-prefetched
        # indices + per-tile DMA gathers so this tensor never round-trips HBM.
        idx = ball_query(self.radius, ns, P2, P1p)             # (B, n_pad, ns) int32
        idx_t = jnp.transpose(idx, (0, 2, 1))                  # (B, ns, n_pad)

        # Displacement in f32 (bf16 subtraction of near-equal points cancels
        # badly); only the small 3-channel result is cast down.
        P2_t = jnp.transpose(P2, (0, 2, 1))                    # (B, 3, M) f32
        P1_t = jnp.transpose(P1p, (0, 2, 1))                   # (B, 3, n_pad) f32
        P2_grouped = grouping_operation_t(P2_t, idx_t)         # (B, ns, 3, n_pad) f32
        displacement = (P2_grouped - P1_t[:, None]).astype(jnp.bfloat16)

        S2_grouped = grouping_operation_t(S2.astype(jnp.bfloat16), idx_t)
        corr = jnp.concatenate([S2_grouped, displacement], axis=2)   # (B, ns, Cs, n_pad)

        if has_x1:
            X1p = jnp.pad(X1, ((0, 0), (0, 0), (0, pad))) if pad else X1
            inv = X1p.astype(jnp.bfloat16)                     # (B, C, n_pad)
            w_inv_bf = w_inv.astype(jnp.bfloat16)
        else:
            inv, w_inv_bf = None, None

        out = fused_conv1x1_relu_max(
            corr, inv, w_samp.astype(jnp.bfloat16), w_inv_bf, bias,
            tile=tile, vmem_limit_bytes=vmem_limit, out_dtype=out_dtype)
        return out[:, :, :N]


# ----------------------------------------------------------------------------
# Pure-JAX f32 reference (follows the PyTorch module verbatim)
# ----------------------------------------------------------------------------
def reference_forward(module, P1, P2, X1, S2):
    ns = module.nsamples
    idx = ball_query(module.radius, ns, P2, P1)                # (B, N, ns)

    def group(feat):                                           # (B, C, M) -> (B, C, N, ns)
        return jax.vmap(lambda f, ix: f[:, ix])(feat, idx)

    P2_g = group(jnp.transpose(P2, (0, 2, 1)))                 # (B, 3, N, ns)
    S2_g = group(S2)                                           # (B, C, N, ns)
    disp = P2_g - jnp.transpose(P1, (0, 2, 1))[..., None]
    if module.in_channels != 0:
        X1_r = jnp.broadcast_to(X1[..., None], X1.shape + (ns,))
        corr = jnp.concatenate([S2_g, X1_r, disp], axis=1)
        w, b = module.fc_w, module.fc_b
    else:
        corr = jnp.concatenate([S2_g, disp], axis=1)
        w, b = module.fc1_w, module.fc1_b
    y = jnp.einsum("oc,bcns->bons", w, corr) + b.reshape(1, -1, 1, 1)
    y = jnp.maximum(y, 0.0)
    return jnp.max(y, axis=-1)                                 # (B, Cout, N)


# ----------------------------------------------------------------------------
if __name__ == "__main__":
    RADIUS = 0.75
    B, C, COUT, NS = 2, 4, 32, 8

    key = jax.random.PRNGKey(0)
    kw, kdata = jax.random.split(key)
    module = PointSpatioTemporalCorrelationPallas(RADIUS, NS, C, COUT, kw)

    def run_case(n_points, data_key):
        kp1, kp2, kx1, ks2 = jax.random.split(data_key, 4)
        P1 = jax.random.uniform(kp1, (B, n_points, 3), jnp.float32)
        P2 = jax.random.uniform(kp2, (B, n_points, 3), jnp.float32)
        X1 = jax.random.normal(kx1, (B, C, n_points), jnp.float32)
        S2 = jax.random.normal(ks2, (B, C, n_points), jnp.float32)
        S1 = jax.block_until_ready(module(P1, P2, X1, S2))
        assert S1.shape == (B, COUT, n_points), S1.shape
        ref = reference_forward(module, P1, P2, X1, S2)
        max_err = float(jnp.max(jnp.abs(S1 - ref)))
        assert jnp.allclose(S1, ref, atol=5e-2, rtol=5e-2), (
            f"mismatch vs f32 reference, max abs err = {max_err}")

    k1, k2 = jax.random.split(kdata)
    run_case(16, k1)    # tiny case: pads 16 -> 128 lanes, single tile per batch
    run_case(640, k2)   # non-128-multiple N: pads to 1024, two 512-lane tiles
    print("KERNEL_OK")
</pallas_src>

<mosaic_0001>
module attributes {stable_mosaic.version = 11 : i64} {
  func.func @_corr_kernel(%arg0: i32, %arg1: i32, %arg2: memref<1x8x7x128xbf16, #tpu.memory_space<vmem>>, %arg3: memref<1x4x128xbf16, #tpu.memory_space<vmem>>, %arg4: memref<32x7xbf16, #tpu.memory_space<vmem>>, %arg5: memref<32x4xbf16, #tpu.memory_space<vmem>>, %arg6: memref<32x1xf32, #tpu.memory_space<vmem>>, %arg7: memref<1x32x128xf32, #tpu.memory_space<vmem>>) attributes {dimension_semantics = [#tpu.dimension_semantics<parallel>, #tpu.dimension_semantics<parallel>], iteration_bounds = array<i64: 2, 1>, scalar_prefetch = 0 : i64, scratch_operands = 0 : i64, tpu.core_type = #tpu.core_type<tc>, window_params = [{transform_indices = @transform_0, window_bounds = array<i64: 1, 8, 7, 128>}, {transform_indices = @transform_1, window_bounds = array<i64: 1, 4, 128>}, {pipeline_mode = #tpu.pipeline_mode<synchronous>, transform_indices = @transform_2, window_bounds = array<i64: 32, 7>}, {pipeline_mode = #tpu.pipeline_mode<synchronous>, transform_indices = @transform_3, window_bounds = array<i64: 32, 4>}, {pipeline_mode = #tpu.pipeline_mode<synchronous>, transform_indices = @transform_4, window_bounds = array<i64: 32, 1>}, {transform_indices = @transform_5, window_bounds = array<i64: 1, 32, 128>}]} {
    %c0 = arith.constant 0 : index
    %c0_0 = arith.constant 0 : index
    %0 = vector.load %arg4[%c0, %c0_0] : memref<32x7xbf16, #tpu.memory_space<vmem>>, vector<32x7xbf16>
    %c0_1 = arith.constant 0 : index
    %c0_2 = arith.constant 0 : index
    %1 = vector.load %arg5[%c0_1, %c0_2] : memref<32x4xbf16, #tpu.memory_space<vmem>>, vector<32x4xbf16>
    %c0_3 = arith.constant 0 : index
    %c0_4 = arith.constant 0 : index
    %2 = vector.load %arg6[%c0_3, %c0_4] : memref<32x1xf32, #tpu.memory_space<vmem>>, vector<32x1xf32>
    %c0_5 = arith.constant 0 : index
    %c0_6 = arith.constant 0 : index
    %c0_7 = arith.constant 0 : index
    %c0_8 = arith.constant 0 : index
    %3 = vector.load %arg2[%c0_5, %c0_6, %c0_7, %c0_8] : memref<1x8x7x128xbf16, #tpu.memory_space<vmem>>, vector<1x1x7x128xbf16>
    %4 = vector.shape_cast %3 : vector<1x1x7x128xbf16> to vector<7x128xbf16>
    %cst = arith.constant dense<0.000000e+00> : vector<32x128xf32>
    %5 = tpu.matmul %0, %4, %cst {dimension_numbers = #tpu.dot_dimension_numbers<[1], [0], [0], [1], [0, 0, 1, 1], [], []>} : vector<32x7xbf16>, vector<7x128xbf16>, vector<32x128xf32> -> vector<32x128xf32>
    %c0_9 = arith.constant 0 : index
    %c1 = arith.constant 1 : index
    %c0_10 = arith.constant 0 : index
    %c0_11 = arith.constant 0 : index
    %6 = vector.load %arg2[%c0_9, %c1, %c0_10, %c0_11] : memref<1x8x7x128xbf16, #tpu.memory_space<vmem>>, vector<1x1x7x128xbf16>
    %7 = vector.shape_cast %6 : vector<1x1x7x128xbf16> to vector<7x128xbf16>
    %cst_12 = arith.constant dense<0.000000e+00> : vector<32x128xf32>
    %8 = tpu.matmul %0, %7, %cst_12 {dimension_numbers = #tpu.dot_dimension_numbers<[1], [0], [0], [1], [0, 0, 1, 1], [], []>} : vector<32x7xbf16>, vector<7x128xbf16>, vector<32x128xf32> -> vector<32x128xf32>
    %9 = arith.maximumf %5, %8 : vector<32x128xf32>
    %c0_13 = arith.constant 0 : index
    %c2 = arith.constant 2 : index
    %c0_14 = arith.constant 0 : index
    %c0_15 = arith.constant 0 : index
    %10 = vector.load %arg2[%c0_13, %c2, %c0_14, %c0_15] : memref<1x8x7x128xbf16, #tpu.memory_space<vmem>>, vector<1x1x7x128xbf16>
    %11 = vector.shape_cast %10 : vector<1x1x7x128xbf16> to vector<7x128xbf16>
    %cst_16 = arith.constant dense<0.000000e+00> : vector<32x128xf32>
    %12 = tpu.matmul %0, %11, %cst_16 {dimension_numbers = #tpu.dot_dimension_numbers<[1], [0], [0], [1], [0, 0, 1, 1], [], []>} : vector<32x7xbf16>, vector<7x128xbf16>, vector<32x128xf32> -> vector<32x128xf32>
    %13 = arith.maximumf %9, %12 : vector<32x128xf32>
    %c0_17 = arith.constant 0 : index
    %c3 = arith.constant 3 : index
    %c0_18 = arith.constant 0 : index
    %c0_19 = arith.constant 0 : index
    %14 = vector.load %arg2[%c0_17, %c3, %c0_18, %c0_19] : memref<1x8x7x128xbf16, #tpu.memory_space<vmem>>, vector<1x1x7x128xbf16>
    %15 = vector.shape_cast %14 : vector<1x1x7x128xbf16> to vector<7x128xbf16>
    %cst_20 = arith.constant dense<0.000000e+00> : vector<32x128xf32>
    %16 = tpu.matmul %0, %15, %cst_20 {dimension_numbers = #tpu.dot_dimension_numbers<[1], [0], [0], [1], [0, 0, 1, 1], [], []>} : vector<32x7xbf16>, vector<7x128xbf16>, vector<32x128xf32> -> vector<32x128xf32>
    %17 = arith.maximumf %13, %16 : vector<32x128xf32>
    %c0_21 = arith.constant 0 : index
    %c4 = arith.constant 4 : index
    %c0_22 = arith.constant 0 : index
    %c0_23 = arith.constant 0 : index
    %18 = vector.load %arg2[%c0_21, %c4, %c0_22, %c0_23] : memref<1x8x7x128xbf16, #tpu.memory_space<vmem>>, vector<1x1x7x128xbf16>
    %19 = vector.shape_cast %18 : vector<1x1x7x128xbf16> to vector<7x128xbf16>
    %cst_24 = arith.constant dense<0.000000e+00> : vector<32x128xf32>
    %20 = tpu.matmul %0, %19, %cst_24 {dimension_numbers = #tpu.dot_dimension_numbers<[1], [0], [0], [1], [0, 0, 1, 1], [], []>} : vector<32x7xbf16>, vector<7x128xbf16>, vector<32x128xf32> -> vector<32x128xf32>
    %21 = arith.maximumf %17, %20 : vector<32x128xf32>
    %c0_25 = arith.constant 0 : index
    %c5 = arith.constant 5 : index
    %c0_26 = arith.constant 0 : index
    %c0_27 = arith.constant 0 : index
    %22 = vector.load %arg2[%c0_25, %c5, %c0_26, %c0_27] : memref<1x8x7x128xbf16, #tpu.memory_space<vmem>>, vector<1x1x7x128xbf16>
    %23 = vector.shape_cast %22 : vector<1x1x7x128xbf16> to vector<7x128xbf16>
    %cst_28 = arith.constant dense<0.000000e+00> : vector<32x128xf32>
    %24 = tpu.matmul %0, %23, %cst_28 {dimension_numbers = #tpu.dot_dimension_numbers<[1], [0], [0], [1], [0, 0, 1, 1], [], []>} : vector<32x7xbf16>, vector<7x128xbf16>, vector<32x128xf32> -> vector<32x128xf32>
    %25 = arith.maximumf %21, %24 : vector<32x128xf32>
    %c0_29 = arith.constant 0 : index
    %c6 = arith.constant 6 : index
    %c0_30 = arith.constant 0 : index
    %c0_31 = arith.constant 0 : index
    %26 = vector.load %arg2[%c0_29, %c6, %c0_30, %c0_31] : memref<1x8x7x128xbf16, #tpu.memory_space<vmem>>, vector<1x1x7x128xbf16>
    %27 = vector.shape_cast %26 : vector<1x1x7x128xbf16> to vector<7x128xbf16>
    %cst_32 = arith.constant dense<0.000000e+00> : vector<32x128xf32>
    %28 = tpu.matmul %0, %27, %cst_32 {dimension_numbers = #tpu.dot_dimension_numbers<[1], [0], [0], [1], [0, 0, 1, 1], [], []>} : vector<32x7xbf16>, vector<7x128xbf16>, vector<32x128xf32> -> vector<32x128xf32>
    %29 = arith.maximumf %25, %28 : vector<32x128xf32>
    %c0_33 = arith.constant 0 : index
    %c7 = arith.constant 7 : index
    %c0_34 = arith.constant 0 : index
    %c0_35 = arith.constant 0 : index
    %30 = vector.load %arg2[%c0_33, %c7, %c0_34, %c0_35] : memref<1x8x7x128xbf16, #tpu.memory_space<vmem>>, vector<1x1x7x128xbf16>
    %31 = vector.shape_cast %30 : vector<1x1x7x128xbf16> to vector<7x128xbf16>
    %cst_36 = arith.constant dense<0.000000e+00> : vector<32x128xf32>
    %32 = tpu.matmul %0, %31, %cst_36 {dimension_numbers = #tpu.dot_dimension_numbers<[1], [0], [0], [1], [0, 0, 1, 1], [], []>} : vector<32x7xbf16>, vector<7x128xbf16>, vector<32x128xf32> -> vector<32x128xf32>
    %33 = arith.maximumf %29, %32 : vector<32x128xf32>
    %c0_37 = arith.constant 0 : index
    %c0_38 = arith.constant 0 : index
    %c0_39 = arith.constant 0 : index
    %34 = vector.load %arg3[%c0_37, %c0_38, %c0_39] : memref<1x4x128xbf16, #tpu.memory_space<vmem>>, vector<1x4x128xbf16>
    %35 = vector.shape_cast %34 : vector<1x4x128xbf16> to vector<4x128xbf16>
    %cst_40 = arith.constant dense<0.000000e+00> : vector<32x128xf32>
    %36 = tpu.matmul %1, %35, %cst_40 {dimension_numbers = #tpu.dot_dimension_numbers<[1], [0], [0], [1], [0, 0, 1, 1], [], []>} : vector<32x4xbf16>, vector<4x128xbf16>, vector<32x128xf32> -> vector<32x128xf32>
    %37 = arith.addf %33, %36 : vector<32x128xf32>
    %38 = vector.broadcast %2 : vector<32x1xf32> to vector<32x128xf32>
    %39 = arith.addf %37, %38 : vector<32x128xf32>
    %cst_41 = arith.constant 0.000000e+00 : f32
    %40 = vector.broadcast %cst_41 : f32 to vector<32x128xf32>
    %41 = arith.maximumf %39, %40 : vector<32x128xf32>
    %c0_42 = arith.constant 0 : index
    %c0_43 = arith.constant 0 : index
    %c0_44 = arith.constant 0 : index
    %42 = vector.load %arg7[%c0_42, %c0_43, %c0_44] : memref<1x32x128xf32, #tpu.memory_space<vmem>>, vector<1x32x128xf32>
    %43 = vector.shape_cast %42 : vector<1x32x128xf32> to vector<32x128xf32>
    %44 = vector.shape_cast %41 : vector<32x128xf32> to vector<1x32x128xf32>
    tpu.vector_store %arg7[%c0_42, %c0_43, %c0_44], %44 {strides = array<i32>} : memref<1x32x128xf32, #tpu.memory_space<vmem>>, vector<1x32x128xf32>,
    return
  }
  func.func @transform_0(%arg0: i32, %arg1: i32) -> (i32, i32, i32, i32) {
    %c0_i32 = arith.constant 0 : i32
    %c0_i32_0 = arith.constant 0 : i32
    %c0_i32_1 = arith.constant 0 : i32
    return %arg0, %c0_i32, %c0_i32_0, %arg1 : i32, i32, i32, i32
  }
  func.func @transform_1(%arg0: i32, %arg1: i32) -> (i32, i32, i32) {
    %c0_i32 = arith.constant 0 : i32
    %c0_i32_0 = arith.constant 0 : i32
    return %arg0, %c0_i32, %arg1 : i32, i32, i32
  }
  func.func @transform_2(%arg0: i32, %arg1: i32) -> (i32, i32) {
    %c0_i32 = arith.constant 0 : i32
    %c0_i32_0 = arith.constant 0 : i32
    %c0_i32_1 = arith.constant 0 : i32
    return %c0_i32, %c0_i32_0 : i32, i32
  }
  func.func @transform_3(%arg0: i32, %arg1: i32) -> (i32, i32) {
    %c0_i32 = arith.constant 0 : i32
    %c0_i32_0 = arith.constant 0 : i32
    %c0_i32_1 = arith.constant 0 : i32
    return %c0_i32, %c0_i32_0 : i32, i32
  }
  func.func @transform_4(%arg0: i32, %arg1: i32) -> (i32, i32) {
    %c0_i32 = arith.constant 0 : i32
    %c0_i32_0 = arith.constant 0 : i32
    %c0_i32_1 = arith.constant 0 : i32
    return %c0_i32, %c0_i32_0 : i32, i32
  }
  func.func @transform_5(%arg0: i32, %arg1: i32) -> (i32, i32, i32) {
    %c0_i32 = arith.constant 0 : i32
    %c0_i32_0 = arith.constant 0 : i32
    return %arg0, %c0_i32, %arg1 : i32, i32, i32
  }
}

</mosaic_0001>

<bundles_post_ra>
// kernel: tpu_custom_call.1
= control target key start
LH: loop header
LB: loop body
LE: loop exit
PB: predicated region body
PF: predicated region fallthrough
CT: control target
= control target key end

     0   :  { %10 = vsyncpa [#allocation3], 0  ;;  %s1104_s0 = inlined_call_operand.vmem [shape: bf16[2,8,7,128], index: 0, kind: input, shape index: {}]   ;;  %s1105_s1 = inlined_call_operand.vmem [shape: bf16[2,4,128], index: 1, kind: input, shape index: {}]   ;;  %s1106_s2 = inlined_call_operand.vmem [shape: bf16[32,7], index: 2, kind: input, shape index: {}]   ;;  %s1107_s3 = inlined_call_operand.vmem [shape: bf16[32,4], index: 3, kind: input, shape index: {}]   ;;  %s1108_s4 = inlined_call_operand.vmem [shape: f32[32,1], index: 4, kind: input, shape index: {}]   ;;  %s1109_s5 = inlined_call_operand.hbm [shape: f32[2,32,128], index: 5, kind: output, shape index: {}]  }
   0x1   :  { %12 = vsyncpa [#allocation3 + $0x1], 0  ;;  %s953_s18 = smov 0   ;;  %s955_s19 = smov 0  }
   0x2   :  { %s957_s20 = smov 0   ;;  %s959_s21 = smov 0  }
   0x3   :  { %s961_s22 = smov 0   ;;  %s963_s23 = smov 0  }
   0x4 LB: > { %s716_s24 = sadd.s32 4294967295, %s917_s23   ;;  %s717_s25 = sadd.s32 4294967294, %s917_s23   ;;  %s917_s23 = sphi %s963_s23, %s18_s23   ;;  %s913_s22 = sphi %s961_s22, %s1116_s22   ;;  %s909_s21 = sphi %s959_s21, %s1115_s21   ;;  %s905_s20 = sphi %s957_s20, %s1114_s20   ;;  %s901_s19 = sphi %s955_s19, %s1113_s19   ;;  %s897_s18 = sphi %s953_s18, %s1112_s18  }
   0x5   : > { %s30_s26 = sadd.s32 1, %s913_s22  ;;  %s158_s27 = sadd.s32 1, %s905_s20 }
   0x6   : > { %p32_p0 = scmp.ge.s32.totalorder %s30_s26, 2  ;;  %p168_p1 = scmp.ne.s32.totalorder %s905_s20, %s901_s19 }
   0x7   : > { %p169_p2 = scmp.eq.s32.totalorder %s716_s24, 1  ;;  %p174_p3 = scmp.ne.s32.totalorder %s901_s19, %s897_s18 }
   0x8   : > { %s1118_s26 = smov (%p32_p0, %s30_s26), 0  ;;  %p175_p5 = scmp.eq.s32.totalorder %s717_s25, 1 }
   0x9   : > { %p993_p4 = por %p169_p2, %p168_p1  ;;  %s153_s29 = ssub.s32 %s913_s22, %s1118_s26 }
   0xa   : > { %p720_p6 = scmp.ge.s32.totalorder %s917_s23, 1  ;;  %p156_p7 = scmp.eq.s32.totalorder %s153_s29, 0 }
   0xb   : > { %p1000_p8 = por %p175_p5, %p174_p3  ;;  %p223_p9 = scmp.lt.s32.totalorder %s917_s23, 3 }
   0xc   : > { %s1006_s6 = scalar_select %p156_p7, %s905_s20, %s158_s27  }
   0xd   : > { %p224_p10 = pnand %p720_p6, %p223_p9 }
   0xe   : > { %p261_p11 = scmp.lt.s32.totalorder (!%p224_p10), %s909_s21, 1  ;;  %s776_s27 = sshll.u32 (!%p224_p10), %s909_s21, 5 }
   0xf   : > { %227 = sbr.rel (%p224_p10) target bundleno = 245 (0xf5), region = 40  ;;  %s859_s15 = scalar_lea.hbm (!%p224_p10), %s1109_s5, 64 }
  0x14   : > { %vm307_vm0 = vcmask 1042432   ;;  %vm308_vm1 = vcmask 1043456   ;;  %v919_v0 = vmov 65535   ;;  %s262_s7 = scalar_select %p261_p11, %s909_s21, 1  ;;  %v772_v4 = vld [vmem:[%s1106_s2] sm:$0xff]  ;;  %v773_v13 = vld [vmem:[%s1106_s2 + $0x8] sm:$0xff] }
  0x15   : > { %v309_v1 = vsel %vm307_vm0, 4294967295, %v919_v0  ;;  %vm300_vm2 = vcmask 56320   ;;  %vm547_vm3 = vcmask 1041408   ;;  %v285_v23 = vld [vmem:[%s1108_s4] sm:$0xff]  ;;  %v920_v24 = vmov 0   ;;  %v287_v25 = vld [vmem:[%s1108_s4 + $0x10] sm:$0xff] }
  0x16   : > { %s771_s8 = sshll.u32 %s262_s7, 5  ;;  %v310_v2 = vsel %vm308_vm1, %v309_v1, 0  ;;  %s724_s9 = sshll.u32 %s262_s7, 1  ;;  %837 = vset.pattern.permute.xlu0 %v920_v24  ;;  %838 = vset.pattern.permute.xlu1 %v920_v24  ;;  %v286_v26 = vld [vmem:[%s1108_s4 + $0x8] sm:$0xff]  ;;  %v288_v27 = vld [vmem:[%s1108_s4 + $0x18] sm:$0xff]  ;;  %v774_v28 = vld [vmem:[%s1107_s3] sm:$0xff] }
  0x17   : > { %s268_s12 = scalar_lea.vmem %s1104_s0, %s771_s8  ;;  %s275_s17 = scalar_lea.vmem %s1105_s1, %s724_s9  ;;  %576 = vperm.xlu0 %837, %v285_v23   ;;  %586 = vperm.xlu1 %838, %v287_v25   ;;  %vm540_vm4 = vcmask 31744   ;;  %v775_v29 = vld [vmem:[%s1107_s3 + $0x8] sm:$0xff] }
  0x18   : > { %v289_v3 = vld [vmem:[%s268_s12] sm:$0xf]  ;;  %v735_v5 = vld [vmem:[%s268_s12 + $0x4] sm:$0xf]  ;;  %v738_v6 = vld [vmem:[%s268_s12 + $0x8] sm:$0xf]  ;;  %s619_s8 = scalar_lea.hbm %s1109_s5, %s776_s27 }
  0x19   : > { %v312_v7 = vand.u32 %v310_v2, %v289_v3  ;;  %v336_v8 = vand.u32 %v735_v5, %v310_v2  ;;  %v364_v9 = vand.u32 %v738_v6, %v310_v2  ;;  %v741_v10 = vld [vmem:[%s268_s12 + $0xc] sm:$0xf]  ;;  %v744_v11 = vld [vmem:[%s268_s12 + $0x10] sm:$0xf]  ;;  %v750_v12 = vld [vmem:[%s268_s12 + $0x18] sm:$0xf] }
  0x1a   : > { %v392_v14 = vand.u32 %v741_v10, %v310_v2  ;;  %v420_v15 = vand.u32 %v744_v11, %v310_v2  ;;  %v753_v16 = vld [vmem:[%s268_s12 + $0x1c] sm:$0xf]  ;;  %v747_v17 = vld [vmem:[%s268_s12 + $0x14] sm:$0xf]  ;;  %v529_v19 = vld [vmem:[%s275_s17] sm:$0x3]  ;;  %v476_v20 = vand.u32 %v750_v12, %v310_v2 }
  0x1b   : > { %321 = vmatpush.bf16.msra.mxu0 %v312_v7  ;;  %777 = vmatpush.bf16.msra.mxu1 %v312_v7  ;;  %v504_v18 = vand.u32 %v753_v16, %v310_v2  ;;  %v448_v21 = vand.u32 %v747_v17, %v310_v2  ;;  %v549_v22 = vsel %vm547_vm3, %v529_v19, 0  ;;  %s258_s17 = sand.u32 1, %s901_s19   ;;  %s622_s10 = sshll.u32 %s619_s8, 4  ;;  %s623_s10 = int_to_ptr.hbm [resolvable:$true] %s622_s10 }
  0x1c   : > { %373 = vmatpush.bf16.msra.mxu2 %v364_v9  ;;  %401 = vmatpush.bf16.msra.mxu3 %v392_v14  ;;  %s721_s24 = sshll.u32 %s258_s17, 5  ;;  %s607_s21 = scalar_lea.sflag [#allocation3], %s258_s17 }
  0x1d   : > { %s1059_s25 = scalar_lea.vmem [#allocation2], %s721_s24  ;;  %s853_s11 = sshra.s32 %s623_s10, 4  ;;  %s854_s11 = int_to_ptr.hbm [resolvable:$true] %s853_s11 }
  0x1e   : > { %733 = vmatmul.msk.bf16.vlgmr.msra.gmra.mxu0 %vm300_vm2, %v772_v4  ;;  %734 = vmatmul.msk.bf16.vlgmr.msra.gmra.mxu1 %vm300_vm2, %v773_v13  ;;  %s620_s9 = sshll.u32 %s1059_s25, 4  ;;  %s855_s12 = scalar_lea.hbm %s854_s11, 32  ;;  %s621_s9 = int_to_ptr.vmem [resolvable:$true] %s620_s9 }
  0x1f   : > { %345 = vmatpush.bf16.msrb.mxu1 %v336_v8  ;;  %429 = vmatpush.bf16.msrb.mxu0 %v420_v15  ;;  %p856_p12 = scmp.ne.s32.totalorder %s854_s11, %s855_s12  ;;  %p860_p1 = scmp.lt.s32.totalorder %s854_s11, %s1109_s5 }
  0x20   : > { %739 = vmatmul.msk.bf16.vlgmr.msra.gmra.mxu2 %vm300_vm2, %v772_v4  ;;  %513 = vmatpush.bf16.msrb.mxu3 %v504_v18  ;;  %p861_p2 = scmp.lt.s32.totalorder %s859_s15, %s855_s12 }
  0x21   : > { %742 = vmatmul.msk.bf16.vlgmr.msra.gmra.mxu3 %vm300_vm2, %v772_v4  ;;  %485 = vmatpush.bf16.msrb.mxu2 %v476_v20  ;;  %p857_p13 = pnand %p856_p12, %p993_p4 }
  0x22   : > { %581 = vperm.xlu0 %837, %v286_v26   ;;  %591 = vperm.xlu1 %838, %v288_v27   ;;  %p862_p3 = por %p861_p2, %p860_p1 }
  0x23   : > { %457 = vmatpush.bf16.msra.mxu1 %v448_v21  ;;  %558 = vmatpush.bf16.msra.mxu0 %v549_v22  ;;  %p858_p0 = pneg %p857_p13 }
  0x25   : > { %p863_p5 = pnand %p862_p3, %p858_p0 }
  0x2e   : > { %736 = vmatmul.msk.bf16.vlgmr.msrb.gmra.mxu1 %vm300_vm2, %v772_v4  ;;  %745 = vmatmul.msk.bf16.vlgmr.msrb.gmra.mxu0 %vm300_vm2, %v772_v4 }
  0x30   : > { %740 = vmatmul.msk.bf16.gmra.mxu2 %vm300_vm2, %v773_v13 }
  0x31   : > { %743 = vmatmul.msk.bf16.gmra.mxu3 %vm300_vm2, %v773_v13 }
  0x3e   : > { %737 = vmatmul.msk.bf16.gmra.mxu1 %vm300_vm2, %v773_v13  ;;  %746 = vmatmul.msk.bf16.gmra.mxu0 %vm300_vm2, %v773_v13 }
  0x40   : > { %751 = vmatmul.msk.bf16.vlgmr.msrb.gmra.mxu2 %vm300_vm2, %v772_v4 }
  0x41   : > { %754 = vmatmul.msk.bf16.vlgmr.msrb.gmra.mxu3 %vm300_vm2, %v772_v4 }
  0x4e   : > { %748 = vmatmul.msk.bf16.vlgmr.msra.gmra.mxu1 %vm300_vm2, %v772_v4  ;;  %764 = vmatmul.msk.bf16.vlgmr.msra.gmra.mxu0 %vm540_vm4, %v774_v28 }
  0x50   : > { %752 = vmatmul.msk.bf16.gmra.mxu2 %vm300_vm2, %v773_v13 }
  0x51   : > { %755 = vmatmul.msk.bf16.gmra.mxu3 %vm300_vm2, %v773_v13 }
  0x5e   : > { %749 = vmatmul.msk.bf16.gmra.mxu1 %vm300_vm2, %v773_v13  ;;  %765 = vmatmul.msk.bf16.gmra.mxu0 %vm540_vm4, %v775_v29 }
  0x89   : > { %v577_v0 = vpop.permute.xlu0 %576 }
  0x94   : > { %v582_v16 = vpop.permute.xlu0 %581 }
  0x9b   : > { %v323_v30 = vpop.f32.mrf.mxu0  ;;  %v328_v31 = vpop.f32.mrf.mxu1 }
  0xa3   : > { %v375_v32 = vpop.f32.mrf.mxu2  ;;  %v325_v33 = vpop.f32.mrf.mxu0 }
  0xa4   : > { %v330_v34 = vpop.f32.mrf.mxu1  ;;  %v403_v35 = vpop.f32.mrf.mxu3 }
  0xab   : > { %v377_v36 = vpop.f32.mrf.mxu2  ;;  %v431_v38 = vpop.f32.mrf.mxu0 }
  0xac   : > { %v347_v37 = vpop.f32.mrf.mxu1  ;;  %v405_v39 = vpop.f32.mrf.mxu3 }
  0xad   : > { %v357_v47 = vmax.f32 %v323_v30, %v347_v37  ;;  %v587_v30 = vpop.permute.xlu1 %586 }
  0xaf   : > { %v385_v49 = vmax.f32 %v357_v47, %v375_v32 }
  0xb1   : > { %v413_v52 = vmax.f32 %v385_v49, %v403_v35 }
  0xb3   : > { %v380_v40 = vpop.f32.mrf.mxu2  ;;  %v433_v42 = vpop.f32.mrf.mxu0  ;;  %v441_v56 = vmax.f32 %v413_v52, %v431_v38 }
  0xb4   : > { %v349_v41 = vpop.f32.mrf.mxu1  ;;  %v408_v43 = vpop.f32.mrf.mxu3 }
  0xb5   : > { %v358_v53 = vmax.f32 %v325_v33, %v349_v41 }
  0xb7   : > { %v386_v57 = vmax.f32 %v358_v53, %v377_v36 }
  0xb9   : > { %v414_v61 = vmax.f32 %v386_v57, %v405_v39 }
  0xbb   : > { %v436_v45 = vpop.f32.mrf.mxu0  ;;  %v382_v46 = vpop.f32.mrf.mxu2  ;;  %v442_v3 = vmax.f32 %v414_v61, %v433_v42 }
  0xbc   : > { %v352_v44 = vpop.f32.mrf.mxu1  ;;  %v410_v48 = vpop.f32.mrf.mxu3 }
  0xbd   : > { %v359_v62 = vmax.f32 %v328_v31, %v352_v44 }
  0xbf   : > { %v387_v4 = vmax.f32 %v359_v62, %v380_v40 }
  0xc1   : > { %v415_v11 = vmax.f32 %v387_v4, %v408_v43  ;;  %v592_v43 = vpop.permute.xlu1 %591 }
  0xc3   : > { %v438_v51 = vpop.f32.mrf.mxu0  ;;  %v487_v54 = vpop.f32.mrf.mxu2  ;;  %v443_v17 = vmax.f32 %v415_v11, %v436_v45 }
  0xc4   : > { %v354_v50 = vpop.f32.mrf.mxu1  ;;  %v515_v55 = vpop.f32.mrf.mxu3 }
  0xc5   : > { %v360_v12 = vmax.f32 %v330_v34, %v354_v50 }
  0xc7   : > { %v388_v18 = vmax.f32 %v360_v12, %v382_v46 }
  0xc9   : > { %v416_v25 = vmax.f32 %v388_v18, %v410_v48 }
  0xcb   : > { %v560_v59 = vpop.f32.mrf.mxu0  ;;  %v489_v2 = vpop.f32.mrf.mxu2  ;;  %v444_v31 = vmax.f32 %v416_v25, %v438_v51 }
  0xcc   : > { %v459_v58 = vpop.f32.mrf.mxu1  ;;  %v517_v6 = vpop.f32.mrf.mxu3 }
  0xcd   : > { %v469_v60 = vmax.f32 %v441_v56, %v459_v58 }
  0xcf   : > { %v497_v63 = vmax.f32 %v469_v60, %v487_v54 }
  0xd1   : > { %v525_v1 = vmax.f32 %v497_v63, %v515_v55 }
  0xd3   : > { %v570_v5 = vadd.f32 %v560_v59, %v525_v1  ;;  %v562_v10 = vpop.f32.mrf.mxu0  ;;  %v492_v20 = vpop.f32.mrf.mxu2 }
  0xd4   : > { %v461_v7 = vpop.f32.mrf.mxu1  ;;  %v520_v24 = vpop.f32.mrf.mxu3 }
  0xd5   : > { %v594_v8 = vadd.f32 %v577_v0, %v570_v5  ;;  %v470_v9 = vmax.f32 %v442_v3, %v461_v7 }
  0xd7   : > { %v598_v13 = vmax.f32 %v594_v8, 0.0  ;;  %v498_v14 = vmax.f32 %v470_v9, %v489_v2 }
  0xd9   : > { %602 = vst [vmem:[%s1059_s25] sm:$0xff] %v598_v13  ;;  %v526_v15 = vmax.f32 %v498_v14, %v517_v6 }
  0xdb   : > { %v571_v19 = vadd.f32 %v562_v10, %v526_v15  ;;  %v565_v28 = vpop.f32.mrf.mxu0  ;;  %v494_v36 = vpop.f32.mrf.mxu2 }
  0xdc   : > { %v464_v21 = vpop.f32.mrf.mxu1  ;;  %v522_v39 = vpop.f32.mrf.mxu3 }
  0xdd   : > { %v595_v22 = vadd.f32 %v582_v16, %v571_v19  ;;  %v471_v23 = vmax.f32 %v443_v17, %v464_v21 }
  0xdf   : > { %v599_v26 = vmax.f32 %v595_v22, 0.0  ;;  %v499_v27 = vmax.f32 %v471_v23, %v492_v20 }
  0xe1   : > { %603 = vst [vmem:[%s1059_s25 + $0x8] sm:$0xff] %v599_v26  ;;  %v527_v29 = vmax.f32 %v499_v27, %v520_v24 }
  0xe3   : > { %v572_v32 = vadd.f32 %v565_v28, %v527_v29  ;;  %v567_v41 = vpop.f32.mrf.mxu0 }
  0xe4   : > { %v466_v33 = vpop.f32.mrf.mxu1 }
  0xe5   : > { %v596_v34 = vadd.f32 %v587_v30, %v572_v32  ;;  %v472_v35 = vmax.f32 %v444_v31, %v466_v33 }
  0xe7   : > { %v600_v37 = vmax.f32 %v596_v34, 0.0  ;;  %v500_v38 = vmax.f32 %v472_v35, %v494_v36 }
  0xe9   : > { %604 = vst [vmem:[%s1059_s25 + $0x10] sm:$0xff] %v600_v37  ;;  %v528_v40 = vmax.f32 %v500_v38, %v522_v39 }
  0xeb   : > { %v573_v42 = vadd.f32 %v567_v41, %v528_v40 }
  0xed   : > { %v597_v44 = vadd.f32 %v592_v43, %v573_v42 }
  0xef   : > { %v601_v45 = vmax.f32 %v597_v44, 0.0 }
  0xf1   : > { %605 = vst [vmem:[%s1059_s25 + $0x18] sm:$0xff] %v601_v45 }
  0xf2   : > { %866 = shalt.err (!%p863_p5)
}
  0xf3   : > { %s921_s17 = smov 128   ;;  %s922_s25 = smov 8  }
  0xf4   : > { %778 = dma.vmem_to_hbm [thread:$0]  (%p993_p4), %s621_s9, 512, %s623_s10, %s607_s21, %s921_s17, %s921_s17, %s922_s25  }
  0xf5 PF: > { %p784_p6 = scmp.ge.s32.totalorder %s917_s23, 2  ;;  %s637_s27 = sand.u32 1, %s897_s18  }
  0xf6   : > { %s638_s29 = scalar_lea.sflag [#allocation3], %s637_s27 }
  0xf7   : > { %p781_p7 = pnand %p784_p6, %p1000_p8 }
  0xf9   : > { %p782_p9 = pneg %p781_p7 }
  0xfb   : > { %892 = dma.done.wait (%p782_p9), %s638_s29, 512  }
  0xfc   : > { %894 = vsyncadd (%p782_p9), %s638_s29, 4294966784  ;;  %s18_s23 = sadd.s32 1, %s917_s23   ;;  %s1112_s18 = smov %s901_s19 }
  0xfd   : > { %p15_p10 = scmp.ge.s32.totalorder %s18_s23, 4   ;;  %s1113_s19 = smov %s905_s20 }
  0xfe   : > { %s1114_s20 = smov %s1006_s6  ;;  %s1115_s21 = smov %s913_s22 }
  0xff   : > { %s1116_s22 = smov %s1118_s26  ;;  %17 = sbr.rel (!%p15_p10) target bundleno = 4 (0x4), region = 85 }
 0x104   :  { %644 = vsyncpa [#allocation3], 1 }
 0x105   :  { %646 = vsyncpa [#allocation3 + $0x1], 1 }

</bundles_post_ra>
